<compile_context>
chip_gen: v7x
topology: tpu7x:2x2x1
jax: 0.10.0
libtpu: 0.0.40
codegen_flags: <defaults>
</compile_context>

<pallas_src>
import numpy as np
import jax
import jax.numpy as jnp
from jax import lax
from jax.experimental import pallas as pl
from jax.experimental.pallas import tpu as pltpu  # noqa: F401  (TPU backend)

# ---------------- configuration (small, consistent with the module) ----------
B = 2          # batch
S = 8          # sequence length
D = 32         # d_model
H = 4          # num_heads
HD = D // H    # head_dim
FFN = 64       # ffn_hidden
EPS = 1e-5
BS = B * S

_SCALE = 1.0 / float(np.sqrt(HD))

# ---------------- single packed parameter slab (f32, (NROWS, C)) -------------
#   rows [0, D)           : [ Wqkv^T (QKV-grouped, Q pre-scaled) | Wo^T | W1^T ]
#   rows [D, D+FFN)       : W2^T            (cols 0:D)
#   rows [ROW_BIAS, +8)   : bqkv | bo | g1 | be1 | b1 | b2 | g2 | be2
#   rows [ROW_MASK, +BS)  : block-diagonal additive attention mask (cols 0:BS)
C = 3 * D + D + FFN        # 192
ROW_WA = 0
ROW_W2 = D
ROW_BIAS = D + FFN
ROW_MASK = ROW_BIAS + 8
NROWS = ROW_MASK + BS      # 120


def encoder_layer_kernel(x_ref, p_ref, o_ref):
    x = x_ref[...]                                   # (BS, D)  f32

    wa = p_ref[ROW_WA:ROW_WA + D, :]                 # (D, C)
    wqkv_t = wa[:, 0:3 * D]                          # (D, 3D)  [Q_all|K_all|V_all]
    wo_t = wa[:, 3 * D:4 * D]                        # (D, D)
    w1_t = wa[:, 4 * D:4 * D + FFN]                  # (D, FFN)
    w2_t = p_ref[ROW_W2:ROW_W2 + FFN, :][:, 0:D]     # (FFN, D)

    pp = p_ref[ROW_BIAS:ROW_BIAS + 8, :]             # (8, C)
    bqkv = pp[0:1, 0:3 * D]
    bo = pp[1:2, 0:D]
    g1 = pp[2:3, 0:D]
    be1 = pp[3:4, 0:D]
    b1 = pp[4:5, 0:FFN]
    b2 = pp[5:6, 0:D]
    g2 = pp[6:7, 0:D]
    be2 = pp[7:8, 0:D]

    # Precomputed block-diagonal additive mask (rows only attend within their
    # own batch element); a compile-time constant riding the slab DMA.
    neg = p_ref[ROW_MASK:ROW_MASK + BS, :][:, 0:BS]  # (BS, BS)

    # ---------------- multi-head self-attention (mask=None) -----------------
    # 1/sqrt(head_dim) is already folded into the Q columns of wqkv_t / bqkv.
    qkv = jnp.dot(x, wqkv_t, preferred_element_type=jnp.float32) + bqkv  # (BS, 3D)

    attn = jnp.zeros((BS, D), jnp.float32)
    for h in range(H):                               # static, H=4
        q = qkv[:, h * HD:(h + 1) * HD]              # (BS, HD), pre-scaled
        k = qkv[:, D + h * HD:D + (h + 1) * HD]      # (BS, HD)
        v = qkv[:, 2 * D + h * HD:2 * D + (h + 1) * HD]
        # q @ k^T: contract last dims of both (MXU-native trans_b form).
        s = lax.dot_general(q, k, (((1,), (1,)), ((), ())),
                            preferred_element_type=jnp.float32) + neg    # (BS, BS)
        s = s - jnp.max(s, axis=-1, keepdims=True)
        p = jnp.exp(s)
        p = p * pl.reciprocal(jnp.sum(p, axis=-1, keepdims=True), approx=True)
        ctx = jnp.dot(p, v, preferred_element_type=jnp.float32)          # (BS, HD)
        # Fold the output projection per head (replaces concat + one big dot).
        attn = attn + jnp.dot(ctx, wo_t[h * HD:(h + 1) * HD, :],
                              preferred_element_type=jnp.float32)
    attn = attn + bo

    # dropout1: identity (eval)

    # ---------------- add & layer-norm 1 -------------------------------------
    h1 = attn + x
    m1 = jnp.mean(h1, axis=-1, keepdims=True)
    v1 = jnp.mean((h1 - m1) ** 2, axis=-1, keepdims=True)
    y1 = (h1 - m1) * lax.rsqrt(v1 + EPS) * g1 + be1

    # ---------------- position-wise feed-forward -----------------------------
    f = jnp.dot(y1, w1_t, preferred_element_type=jnp.float32) + b1
    f = jnp.maximum(f, 0.0)                       # ReLU
    # ffn-internal dropout: identity (eval)
    f = jnp.dot(f, w2_t, preferred_element_type=jnp.float32) + b2

    # dropout2: identity (eval)

    # ---------------- add & layer-norm 2 -------------------------------------
    h2 = f + y1
    m2 = jnp.mean(h2, axis=-1, keepdims=True)
    v2 = jnp.mean((h2 - m2) ** 2, axis=-1, keepdims=True)
    o_ref[...] = ((h2 - m2) * lax.rsqrt(v2 + EPS) * g2 + be2).astype(o_ref.dtype)


def pack_params(params):
    """One-time (init-time) layout plumbing: transpose, permute, scale, pack.

    Runs in numpy on the host; NOT part of the per-call jitted forward.
    """
    (wqkv, bqkv, wo, bo, g1, be1, w1, b1, w2, b2, g2, be2) = [
        np.asarray(p, np.float32) for p in params]

    # Re-group Wqkv output features from per-head [q|k|v] to [Q_all|K_all|V_all].
    perm = np.concatenate([
        np.concatenate([np.arange(h * 3 * HD + c * HD, h * 3 * HD + (c + 1) * HD)
                        for h in range(H)])
        for c in range(3)])
    wqkv_t = wqkv[perm, :].T.copy()          # (D, 3D)
    bqkv_p = bqkv[:, perm].copy()            # (1, 3D)
    # Fold 1/sqrt(head_dim) into the Q projection (free: one-time, wrapper-side).
    wqkv_t[:, 0:D] *= _SCALE
    bqkv_p[:, 0:D] *= _SCALE

    slab = np.zeros((NROWS, C), np.float32)
    slab[ROW_WA:ROW_WA + D, 0:3 * D] = wqkv_t
    slab[ROW_WA:ROW_WA + D, 3 * D:4 * D] = wo.T
    slab[ROW_WA:ROW_WA + D, 4 * D:4 * D + FFN] = w1.T
    slab[ROW_W2:ROW_W2 + FFN, 0:D] = w2.T
    slab[ROW_BIAS + 0, 0:3 * D] = bqkv_p[0]
    slab[ROW_BIAS + 1, 0:D] = bo[0]
    slab[ROW_BIAS + 2, 0:D] = g1[0]
    slab[ROW_BIAS + 3, 0:D] = be1[0]
    slab[ROW_BIAS + 4, 0:FFN] = b1[0]
    slab[ROW_BIAS + 5, 0:D] = b2[0]
    slab[ROW_BIAS + 6, 0:D] = g2[0]
    slab[ROW_BIAS + 7, 0:D] = be2[0]
    r = np.arange(BS)[:, None] // S
    c = np.arange(BS)[None, :] // S
    slab[ROW_MASK:ROW_MASK + BS, 0:BS] = np.where(r == c, 0.0, -1e30)
    return jnp.asarray(slab)


@jax.jit
def encoder_layer(x, slab):
    """Forward pass. `slab` is the pre-packed parameter slab (pack_params)."""
    x2 = x.reshape(BS, D)
    out = pl.pallas_call(
        encoder_layer_kernel,
        out_shape=jax.ShapeDtypeStruct((BS, D), jnp.float32),
    )(x2, slab)
    return out.reshape(B, S, D)


def init_params(key):
    ks = jax.random.split(key, 8)
    scale = 0.05
    wqkv = scale * jax.random.normal(ks[0], (3 * D, D), jnp.float32)
    bqkv = scale * jax.random.normal(ks[1], (1, 3 * D), jnp.float32)
    wo = scale * jax.random.normal(ks[2], (D, D), jnp.float32)
    bo = scale * jax.random.normal(ks[3], (1, D), jnp.float32)
    g1 = jnp.ones((1, D), jnp.float32)
    be1 = jnp.zeros((1, D), jnp.float32)
    w1 = scale * jax.random.normal(ks[4], (FFN, D), jnp.float32)
    b1 = scale * jax.random.normal(ks[5], (1, FFN), jnp.float32)
    w2 = scale * jax.random.normal(ks[6], (D, FFN), jnp.float32)
    b2 = scale * jax.random.normal(ks[7], (1, D), jnp.float32)
    g2 = jnp.ones((1, D), jnp.float32)
    be2 = jnp.zeros((1, D), jnp.float32)
    return (wqkv, bqkv, wo, bo, g1, be1, w1, b1, w2, b2, g2, be2)


def reference_encoder_layer(x, params):
    """Pure-JAX reference matching the PyTorch forward, for a sanity check."""
    (wqkv, bqkv, wo, bo, g1, be1, w1, b1, w2, b2, g2, be2) = params

    def layernorm(h, gamma, beta):
        m = jnp.mean(h, axis=-1, keepdims=True)
        v = jnp.mean((h - m) ** 2, axis=-1, keepdims=True)
        return gamma[0] * (h - m) / jnp.sqrt(v + EPS) + beta[0]

    qkv = x @ wqkv.T + bqkv[0]                                # (B, S, 3D)
    qkv = qkv.reshape(B, S, H, 3 * HD).transpose(0, 2, 1, 3)  # (B, H, S, 3HD)
    q, k, v = jnp.split(qkv, 3, axis=-1)
    s = jnp.einsum("bhqd,bhkd->bhqk", q, k) / jnp.sqrt(jnp.float32(HD))
    p = jax.nn.softmax(s, axis=-1)
    o = jnp.einsum("bhqk,bhkd->bhqd", p, v)
    o = o.transpose(0, 2, 1, 3).reshape(B, S, D)
    attn = o @ wo.T + bo[0]

    y1 = layernorm(attn + x, g1, be1)
    f = jnp.maximum(y1 @ w1.T + b1[0], 0.0) @ w2.T + b2[0]
    return layernorm(f + y1, g2, be2)


if __name__ == "__main__":
    key = jax.random.PRNGKey(0)
    kx, kp = jax.random.split(key)
    x = jax.random.normal(kx, (B, S, D), jnp.float32)
    params = init_params(kp)

    # Pack once at init — NOT inside the jitted per-call forward.
    slab = pack_params(params)

    out = jax.block_until_ready(encoder_layer(x, slab))
    ref = reference_encoder_layer(x, params)
    assert out.shape == (B, S, D)
    # Tolerance relaxed slightly because the softmax denominator uses the
    # approximate EUP reciprocal (pl.reciprocal(approx=True)).
    assert jnp.allclose(out, ref, atol=2e-3, rtol=2e-3), (
        float(jnp.max(jnp.abs(out - ref))))
    print("KERNEL_OK")
</pallas_src>

<mosaic_0001>
module attributes {stable_mosaic.version = 11 : i64} {
  func.func @encoder_layer_kernel(%arg0: memref<16x32xf32, #tpu.memory_space<vmem>>, %arg1: memref<120x192xf32, #tpu.memory_space<vmem>>, %arg2: memref<16x32xf32, #tpu.memory_space<vmem>>) attributes {dimension_semantics = [], scalar_prefetch = 0 : i64, scratch_operands = 0 : i64, tpu.core_type = #tpu.core_type<tc>} {
    %c0 = arith.constant 0 : index
    %c0_0 = arith.constant 0 : index
    %0 = vector.load %arg0[%c0, %c0_0] : memref<16x32xf32, #tpu.memory_space<vmem>>, vector<16x32xf32>
    %c0_1 = arith.constant 0 : index
    %c0_2 = arith.constant 0 : index
    %1 = vector.load %arg1[%c0_1, %c0_2] : memref<120x192xf32, #tpu.memory_space<vmem>>, vector<32x192xf32>
    %2 = vector.extract_strided_slice %1 {offsets = [0, 0], sizes = [32, 96], strides = [1, 1]} : vector<32x192xf32> to vector<32x96xf32>
    %3 = vector.extract_strided_slice %1 {offsets = [0, 96], sizes = [32, 32], strides = [1, 1]} : vector<32x192xf32> to vector<32x32xf32>
    %4 = vector.extract_strided_slice %1 {offsets = [0, 128], sizes = [32, 64], strides = [1, 1]} : vector<32x192xf32> to vector<32x64xf32>
    %c32 = arith.constant 32 : index
    %c0_3 = arith.constant 0 : index
    %5 = vector.load %arg1[%c32, %c0_3] : memref<120x192xf32, #tpu.memory_space<vmem>>, vector<64x192xf32>
    %6 = vector.extract_strided_slice %5 {offsets = [0, 0], sizes = [64, 32], strides = [1, 1]} : vector<64x192xf32> to vector<64x32xf32>
    %c96 = arith.constant 96 : index
    %c0_4 = arith.constant 0 : index
    %7 = vector.load %arg1[%c96, %c0_4] : memref<120x192xf32, #tpu.memory_space<vmem>>, vector<8x192xf32>
    %8 = vector.extract_strided_slice %7 {offsets = [0, 0], sizes = [1, 96], strides = [1, 1]} : vector<8x192xf32> to vector<1x96xf32>
    %9 = vector.extract_strided_slice %7 {offsets = [1, 0], sizes = [1, 32], strides = [1, 1]} : vector<8x192xf32> to vector<1x32xf32>
    %10 = vector.extract_strided_slice %7 {offsets = [2, 0], sizes = [1, 32], strides = [1, 1]} : vector<8x192xf32> to vector<1x32xf32>
    %11 = vector.extract_strided_slice %7 {offsets = [3, 0], sizes = [1, 32], strides = [1, 1]} : vector<8x192xf32> to vector<1x32xf32>
    %12 = vector.extract_strided_slice %7 {offsets = [4, 0], sizes = [1, 64], strides = [1, 1]} : vector<8x192xf32> to vector<1x64xf32>
    %13 = vector.extract_strided_slice %7 {offsets = [5, 0], sizes = [1, 32], strides = [1, 1]} : vector<8x192xf32> to vector<1x32xf32>
    %14 = vector.extract_strided_slice %7 {offsets = [6, 0], sizes = [1, 32], strides = [1, 1]} : vector<8x192xf32> to vector<1x32xf32>
    %15 = vector.extract_strided_slice %7 {offsets = [7, 0], sizes = [1, 32], strides = [1, 1]} : vector<8x192xf32> to vector<1x32xf32>
    %c104 = arith.constant 104 : index
    %c0_5 = arith.constant 0 : index
    %16 = vector.load %arg1[%c104, %c0_5] : memref<120x192xf32, #tpu.memory_space<vmem>>, vector<16x192xf32>
    %17 = vector.extract_strided_slice %16 {offsets = [0, 0], sizes = [16, 16], strides = [1, 1]} : vector<16x192xf32> to vector<16x16xf32>
    %cst = arith.constant dense<0.000000e+00> : vector<16x96xf32>
    %18 = tpu.matmul %0, %2, %cst {dimension_numbers = #tpu.dot_dimension_numbers<[1], [0], [0], [1], [0, 0, 1, 1], [], []>} : vector<16x32xf32>, vector<32x96xf32>, vector<16x96xf32> -> vector<16x96xf32>
    %19 = vector.broadcast %8 : vector<1x96xf32> to vector<16x96xf32>
    %20 = arith.addf %18, %19 : vector<16x96xf32>
    %cst_6 = arith.constant 0.000000e+00 : f32
    %21 = vector.broadcast %cst_6 : f32 to vector<16x32xf32>
    %22 = vector.extract_strided_slice %20 {offsets = [0, 0], sizes = [16, 8], strides = [1, 1]} : vector<16x96xf32> to vector<16x8xf32>
    %23 = vector.extract_strided_slice %20 {offsets = [0, 32], sizes = [16, 8], strides = [1, 1]} : vector<16x96xf32> to vector<16x8xf32>
    %24 = vector.extract_strided_slice %20 {offsets = [0, 64], sizes = [16, 8], strides = [1, 1]} : vector<16x96xf32> to vector<16x8xf32>
    %cst_7 = arith.constant dense<0.000000e+00> : vector<16x16xf32>
    %25 = tpu.matmul %22, %23, %cst_7 {dimension_numbers = #tpu.dot_dimension_numbers<[1], [1], [0], [0], [0, 0, 1, 0], [], []>} : vector<16x8xf32>, vector<16x8xf32>, vector<16x16xf32> -> vector<16x16xf32>
    %26 = arith.addf %25, %17 : vector<16x16xf32>
    %cst_8 = arith.constant dense<0xFF800000> : vector<16xf32>
    %27 = vector.multi_reduction <maximumf>, %26, %cst_8 [1] : vector<16x16xf32> to vector<16xf32>
    %28 = vector.shape_cast %27 : vector<16xf32> to vector<16x1xf32>
    %29 = vector.broadcast %28 : vector<16x1xf32> to vector<16x16xf32>
    %30 = arith.subf %26, %29 : vector<16x16xf32>
    %31 = math.exp %30 : vector<16x16xf32>
    %cst_9 = arith.constant dense<0.000000e+00> : vector<16xf32>
    %32 = vector.multi_reduction <add>, %31, %cst_9 [1] : vector<16x16xf32> to vector<16xf32>
    %33 = vector.shape_cast %32 : vector<16xf32> to vector<16x1xf32>
    %34 = tpu.reciprocal %33 {approx = true} : vector<16x1xf32> -> vector<16x1xf32>
    %35 = vector.broadcast %34 : vector<16x1xf32> to vector<16x16xf32>
    %36 = arith.mulf %31, %35 : vector<16x16xf32>
    %cst_10 = arith.constant dense<0.000000e+00> : vector<16x8xf32>
    %37 = tpu.matmul %36, %24, %cst_10 {dimension_numbers = #tpu.dot_dimension_numbers<[1], [0], [0], [1], [0, 0, 1, 1], [], []>} : vector<16x16xf32>, vector<16x8xf32>, vector<16x8xf32> -> vector<16x8xf32>
    %38 = vector.extract_strided_slice %3 {offsets = [0, 0], sizes = [8, 32], strides = [1, 1]} : vector<32x32xf32> to vector<8x32xf32>
    %cst_11 = arith.constant dense<0.000000e+00> : vector<16x32xf32>
    %39 = tpu.matmul %37, %38, %cst_11 {dimension_numbers = #tpu.dot_dimension_numbers<[1], [0], [0], [1], [0, 0, 1, 1], [], []>} : vector<16x8xf32>, vector<8x32xf32>, vector<16x32xf32> -> vector<16x32xf32>
    %40 = arith.addf %21, %39 : vector<16x32xf32>
    %41 = vector.extract_strided_slice %20 {offsets = [0, 8], sizes = [16, 8], strides = [1, 1]} : vector<16x96xf32> to vector<16x8xf32>
    %42 = vector.extract_strided_slice %20 {offsets = [0, 40], sizes = [16, 8], strides = [1, 1]} : vector<16x96xf32> to vector<16x8xf32>
    %43 = vector.extract_strided_slice %20 {offsets = [0, 72], sizes = [16, 8], strides = [1, 1]} : vector<16x96xf32> to vector<16x8xf32>
    %cst_12 = arith.constant dense<0.000000e+00> : vector<16x16xf32>
    %44 = tpu.matmul %41, %42, %cst_12 {dimension_numbers = #tpu.dot_dimension_numbers<[1], [1], [0], [0], [0, 0, 1, 0], [], []>} : vector<16x8xf32>, vector<16x8xf32>, vector<16x16xf32> -> vector<16x16xf32>
    %45 = arith.addf %44, %17 : vector<16x16xf32>
    %cst_13 = arith.constant dense<0xFF800000> : vector<16xf32>
    %46 = vector.multi_reduction <maximumf>, %45, %cst_13 [1] : vector<16x16xf32> to vector<16xf32>
    %47 = vector.shape_cast %46 : vector<16xf32> to vector<16x1xf32>
    %48 = vector.broadcast %47 : vector<16x1xf32> to vector<16x16xf32>
    %49 = arith.subf %45, %48 : vector<16x16xf32>
    %50 = math.exp %49 : vector<16x16xf32>
    %cst_14 = arith.constant dense<0.000000e+00> : vector<16xf32>
    %51 = vector.multi_reduction <add>, %50, %cst_14 [1] : vector<16x16xf32> to vector<16xf32>
    %52 = vector.shape_cast %51 : vector<16xf32> to vector<16x1xf32>
    %53 = tpu.reciprocal %52 {approx = true} : vector<16x1xf32> -> vector<16x1xf32>
    %54 = vector.broadcast %53 : vector<16x1xf32> to vector<16x16xf32>
    %55 = arith.mulf %50, %54 : vector<16x16xf32>
    %cst_15 = arith.constant dense<0.000000e+00> : vector<16x8xf32>
    %56 = tpu.matmul %55, %43, %cst_15 {dimension_numbers = #tpu.dot_dimension_numbers<[1], [0], [0], [1], [0, 0, 1, 1], [], []>} : vector<16x16xf32>, vector<16x8xf32>, vector<16x8xf32> -> vector<16x8xf32>
    %57 = vector.extract_strided_slice %3 {offsets = [8, 0], sizes = [8, 32], strides = [1, 1]} : vector<32x32xf32> to vector<8x32xf32>
    %cst_16 = arith.constant dense<0.000000e+00> : vector<16x32xf32>
    %58 = tpu.matmul %56, %57, %cst_16 {dimension_numbers = #tpu.dot_dimension_numbers<[1], [0], [0], [1], [0, 0, 1, 1], [], []>} : vector<16x8xf32>, vector<8x32xf32>, vector<16x32xf32> -> vector<16x32xf32>
    %59 = arith.addf %40, %58 : vector<16x32xf32>
    %60 = vector.extract_strided_slice %20 {offsets = [0, 16], sizes = [16, 8], strides = [1, 1]} : vector<16x96xf32> to vector<16x8xf32>
    %61 = vector.extract_strided_slice %20 {offsets = [0, 48], sizes = [16, 8], strides = [1, 1]} : vector<16x96xf32> to vector<16x8xf32>
    %62 = vector.extract_strided_slice %20 {offsets = [0, 80], sizes = [16, 8], strides = [1, 1]} : vector<16x96xf32> to vector<16x8xf32>
    %cst_17 = arith.constant dense<0.000000e+00> : vector<16x16xf32>
    %63 = tpu.matmul %60, %61, %cst_17 {dimension_numbers = #tpu.dot_dimension_numbers<[1], [1], [0], [0], [0, 0, 1, 0], [], []>} : vector<16x8xf32>, vector<16x8xf32>, vector<16x16xf32> -> vector<16x16xf32>
    %64 = arith.addf %63, %17 : vector<16x16xf32>
    %cst_18 = arith.constant dense<0xFF800000> : vector<16xf32>
    %65 = vector.multi_reduction <maximumf>, %64, %cst_18 [1] : vector<16x16xf32> to vector<16xf32>
    %66 = vector.shape_cast %65 : vector<16xf32> to vector<16x1xf32>
    %67 = vector.broadcast %66 : vector<16x1xf32> to vector<16x16xf32>
    %68 = arith.subf %64, %67 : vector<16x16xf32>
    %69 = math.exp %68 : vector<16x16xf32>
    %cst_19 = arith.constant dense<0.000000e+00> : vector<16xf32>
    %70 = vector.multi_reduction <add>, %69, %cst_19 [1] : vector<16x16xf32> to vector<16xf32>
    %71 = vector.shape_cast %70 : vector<16xf32> to vector<16x1xf32>
    %72 = tpu.reciprocal %71 {approx = true} : vector<16x1xf32> -> vector<16x1xf32>
    %73 = vector.broadcast %72 : vector<16x1xf32> to vector<16x16xf32>
    %74 = arith.mulf %69, %73 : vector<16x16xf32>
    %cst_20 = arith.constant dense<0.000000e+00> : vector<16x8xf32>
    %75 = tpu.matmul %74, %62, %cst_20 {dimension_numbers = #tpu.dot_dimension_numbers<[1], [0], [0], [1], [0, 0, 1, 1], [], []>} : vector<16x16xf32>, vector<16x8xf32>, vector<16x8xf32> -> vector<16x8xf32>
    %76 = vector.extract_strided_slice %3 {offsets = [16, 0], sizes = [8, 32], strides = [1, 1]} : vector<32x32xf32> to vector<8x32xf32>
    %cst_21 = arith.constant dense<0.000000e+00> : vector<16x32xf32>
    %77 = tpu.matmul %75, %76, %cst_21 {dimension_numbers = #tpu.dot_dimension_numbers<[1], [0], [0], [1], [0, 0, 1, 1], [], []>} : vector<16x8xf32>, vector<8x32xf32>, vector<16x32xf32> -> vector<16x32xf32>
    %78 = arith.addf %59, %77 : vector<16x32xf32>
    %79 = vector.extract_strided_slice %20 {offsets = [0, 24], sizes = [16, 8], strides = [1, 1]} : vector<16x96xf32> to vector<16x8xf32>
    %80 = vector.extract_strided_slice %20 {offsets = [0, 56], sizes = [16, 8], strides = [1, 1]} : vector<16x96xf32> to vector<16x8xf32>
    %81 = vector.extract_strided_slice %20 {offsets = [0, 88], sizes = [16, 8], strides = [1, 1]} : vector<16x96xf32> to vector<16x8xf32>
    %cst_22 = arith.constant dense<0.000000e+00> : vector<16x16xf32>
    %82 = tpu.matmul %79, %80, %cst_22 {dimension_numbers = #tpu.dot_dimension_numbers<[1], [1], [0], [0], [0, 0, 1, 0], [], []>} : vector<16x8xf32>, vector<16x8xf32>, vector<16x16xf32> -> vector<16x16xf32>
    %83 = arith.addf %82, %17 : vector<16x16xf32>
    %cst_23 = arith.constant dense<0xFF800000> : vector<16xf32>
    %84 = vector.multi_reduction <maximumf>, %83, %cst_23 [1] : vector<16x16xf32> to vector<16xf32>
    %85 = vector.shape_cast %84 : vector<16xf32> to vector<16x1xf32>
    %86 = vector.broadcast %85 : vector<16x1xf32> to vector<16x16xf32>
    %87 = arith.subf %83, %86 : vector<16x16xf32>
    %88 = math.exp %87 : vector<16x16xf32>
    %cst_24 = arith.constant dense<0.000000e+00> : vector<16xf32>
    %89 = vector.multi_reduction <add>, %88, %cst_24 [1] : vector<16x16xf32> to vector<16xf32>
    %90 = vector.shape_cast %89 : vector<16xf32> to vector<16x1xf32>
    %91 = tpu.reciprocal %90 {approx = true} : vector<16x1xf32> -> vector<16x1xf32>
    %92 = vector.broadcast %91 : vector<16x1xf32> to vector<16x16xf32>
    %93 = arith.mulf %88, %92 : vector<16x16xf32>
    %cst_25 = arith.constant dense<0.000000e+00> : vector<16x8xf32>
    %94 = tpu.matmul %93, %81, %cst_25 {dimension_numbers = #tpu.dot_dimension_numbers<[1], [0], [0], [1], [0, 0, 1, 1], [], []>} : vector<16x16xf32>, vector<16x8xf32>, vector<16x8xf32> -> vector<16x8xf32>
    %95 = vector.extract_strided_slice %3 {offsets = [24, 0], sizes = [8, 32], strides = [1, 1]} : vector<32x32xf32> to vector<8x32xf32>
    %cst_26 = arith.constant dense<0.000000e+00> : vector<16x32xf32>
    %96 = tpu.matmul %94, %95, %cst_26 {dimension_numbers = #tpu.dot_dimension_numbers<[1], [0], [0], [1], [0, 0, 1, 1], [], []>} : vector<16x8xf32>, vector<8x32xf32>, vector<16x32xf32> -> vector<16x32xf32>
    %97 = arith.addf %78, %96 : vector<16x32xf32>
    %98 = vector.broadcast %9 : vector<1x32xf32> to vector<16x32xf32>
    %99 = arith.addf %97, %98 : vector<16x32xf32>
    %100 = arith.addf %99, %0 : vector<16x32xf32>
    %cst_27 = arith.constant dense<0.000000e+00> : vector<16xf32>
    %101 = vector.multi_reduction <add>, %100, %cst_27 [1] : vector<16x32xf32> to vector<16xf32>
    %102 = vector.shape_cast %101 : vector<16xf32> to vector<16x1xf32>
    %cst_28 = arith.constant 3.200000e+01 : f32
    %103 = vector.broadcast %cst_28 : f32 to vector<16x1xf32>
    %104 = arith.divf %102, %103 : vector<16x1xf32>
    %105 = vector.broadcast %104 : vector<16x1xf32> to vector<16x32xf32>
    %106 = arith.subf %100, %105 : vector<16x32xf32>
    %107 = arith.mulf %106, %106 : vector<16x32xf32>
    %cst_29 = arith.constant dense<0.000000e+00> : vector<16xf32>
    %108 = vector.multi_reduction <add>, %107, %cst_29 [1] : vector<16x32xf32> to vector<16xf32>
    %109 = vector.shape_cast %108 : vector<16xf32> to vector<16x1xf32>
    %cst_30 = arith.constant 3.200000e+01 : f32
    %110 = vector.broadcast %cst_30 : f32 to vector<16x1xf32>
    %111 = arith.divf %109, %110 : vector<16x1xf32>
    %112 = vector.broadcast %104 : vector<16x1xf32> to vector<16x32xf32>
    %113 = arith.subf %100, %112 : vector<16x32xf32>
    %cst_31 = arith.constant 9.99999974E-6 : f32
    %114 = vector.broadcast %cst_31 : f32 to vector<16x1xf32>
    %115 = arith.addf %111, %114 : vector<16x1xf32>
    %116 = math.rsqrt %115 : vector<16x1xf32>
    %117 = vector.broadcast %116 : vector<16x1xf32> to vector<16x32xf32>
    %118 = arith.mulf %113, %117 : vector<16x32xf32>
    %119 = vector.broadcast %10 : vector<1x32xf32> to vector<16x32xf32>
    %120 = arith.mulf %118, %119 : vector<16x32xf32>
    %121 = vector.broadcast %11 : vector<1x32xf32> to vector<16x32xf32>
    %122 = arith.addf %120, %121 : vector<16x32xf32>
    %cst_32 = arith.constant dense<0.000000e+00> : vector<16x64xf32>
    %123 = tpu.matmul %122, %4, %cst_32 {dimension_numbers = #tpu.dot_dimension_numbers<[1], [0], [0], [1], [0, 0, 1, 1], [], []>} : vector<16x32xf32>, vector<32x64xf32>, vector<16x64xf32> -> vector<16x64xf32>
    %124 = vector.broadcast %12 : vector<1x64xf32> to vector<16x64xf32>
    %125 = arith.addf %123, %124 : vector<16x64xf32>
    %cst_33 = arith.constant 0.000000e+00 : f32
    %126 = vector.broadcast %cst_33 : f32 to vector<16x64xf32>
    %127 = arith.maximumf %125, %126 : vector<16x64xf32>
    %cst_34 = arith.constant dense<0.000000e+00> : vector<16x32xf32>
    %128 = tpu.matmul %127, %6, %cst_34 {dimension_numbers = #tpu.dot_dimension_numbers<[1], [0], [0], [1], [0, 0, 1, 1], [], []>} : vector<16x64xf32>, vector<64x32xf32>, vector<16x32xf32> -> vector<16x32xf32>
    %129 = vector.broadcast %13 : vector<1x32xf32> to vector<16x32xf32>
    %130 = arith.addf %128, %129 : vector<16x32xf32>
    %131 = arith.addf %130, %122 : vector<16x32xf32>
    %cst_35 = arith.constant dense<0.000000e+00> : vector<16xf32>
    %132 = vector.multi_reduction <add>, %131, %cst_35 [1] : vector<16x32xf32> to vector<16xf32>
    %133 = vector.shape_cast %132 : vector<16xf32> to vector<16x1xf32>
    %cst_36 = arith.constant 3.200000e+01 : f32
    %134 = vector.broadcast %cst_36 : f32 to vector<16x1xf32>
    %135 = arith.divf %133, %134 : vector<16x1xf32>
    %136 = vector.broadcast %135 : vector<16x1xf32> to vector<16x32xf32>
    %137 = arith.subf %131, %136 : vector<16x32xf32>
    %138 = arith.mulf %137, %137 : vector<16x32xf32>
    %cst_37 = arith.constant dense<0.000000e+00> : vector<16xf32>
    %139 = vector.multi_reduction <add>, %138, %cst_37 [1] : vector<16x32xf32> to vector<16xf32>
    %140 = vector.shape_cast %139 : vector<16xf32> to vector<16x1xf32>
    %cst_38 = arith.constant 3.200000e+01 : f32
    %141 = vector.broadcast %cst_38 : f32 to vector<16x1xf32>
    %142 = arith.divf %140, %141 : vector<16x1xf32>
    %143 = vector.broadcast %135 : vector<16x1xf32> to vector<16x32xf32>
    %144 = arith.subf %131, %143 : vector<16x32xf32>
    %cst_39 = arith.constant 9.99999974E-6 : f32
    %145 = vector.broadcast %cst_39 : f32 to vector<16x1xf32>
    %146 = arith.addf %142, %145 : vector<16x1xf32>
    %147 = math.rsqrt %146 : vector<16x1xf32>
    %148 = vector.broadcast %147 : vector<16x1xf32> to vector<16x32xf32>
    %149 = arith.mulf %144, %148 : vector<16x32xf32>
    %150 = vector.broadcast %14 : vector<1x32xf32> to vector<16x32xf32>
    %151 = arith.mulf %149, %150 : vector<16x32xf32>
    %152 = vector.broadcast %15 : vector<1x32xf32> to vector<16x32xf32>
    %153 = arith.addf %151, %152 : vector<16x32xf32>
    %c0_40 = arith.constant 0 : index
    %c0_41 = arith.constant 0 : index
    %154 = vector.load %arg2[%c0_40, %c0_41] : memref<16x32xf32, #tpu.memory_space<vmem>>, vector<16x32xf32>
    tpu.vector_store %arg2[%c0_40, %c0_41], %153 {strides = array<i32>} : memref<16x32xf32, #tpu.memory_space<vmem>>, vector<16x32xf32>,
    return
  }
}

</mosaic_0001>

<bundles_post_ra>
// kernel: encoder_layer.1
= control target key start
LH: loop header
LB: loop body
LE: loop exit
PB: predicated region body
PF: predicated region fallthrough
CT: control target
= control target key end

     0   :  { %vm37_vm0 = vcmask 261120   ;;  %s2228_s0 = inlined_call_operand.vmem [shape: f32[16,32], index: 0, kind: input, shape index: {}]   ;;  %s2229_s1 = inlined_call_operand.vmem [shape: f32[120,192], index: 1, kind: input, shape index: {}]   ;;  %s2230_s2 = inlined_call_operand.hbm [shape: f32[16,32], index: 2, kind: output, shape index: {}]  }
   0x1   :  { %v1992_v0 = vld [vmem:[%s2229_s1] sm:$0xff]  ;;  %v1997_v1 = vld [vmem:[%s2229_s1 + $0x10] sm:$0xff] }
   0x2   :  { %v2002_v2 = vld [vmem:[%s2229_s1 + $0x20] sm:$0xff]  ;;  %v1762_v3 = vpack.c.bf16 %v1997_v1, %v1992_v0  ;;  %v2009_v4 = vld [vmem:[%s2229_s1 + $0x30] sm:$0xff] }
   0x3   :  { %v2014_v5 = vld [vmem:[%s2228_s0] sm:$0xff]  ;;  %v1766_v6 = vpack.c.bf16 %v2009_v4, %v2002_v2 }
   0x4   :  { %1653 = vmatprep.mubr.msk.f32.mxu1 %vm37_vm0, %v2014_v5 }
   0x5   :  { %7 = vsyncpa [#allocation3], 0  ;;  %1763 = vmatprep.subr.bf16.mxu1 %v1762_v3  ;;  %v2023_v7 = vld [vmem:[%s2228_s0 + $0x8] sm:$0xff]  ;;  %v33_v8 = vlaneseq  ;;  %v2033_v11 = vld [vmem:[%s2229_s1 + $0xc0] sm:$0xff]  ;;  %vm125_vm1 = vcmask 64512   ;;  %s1959_s0 = smov 120  }
   0x6   :  { %1765 = vmatpush3.bf16.msra.mxu1 %v1762_v3  ;;  %s1960_s23 = smov 96   ;;  %s1961_s24 = smov 88   ;;  %vm2055_vm2 = vmpackc.low %vm125_vm1, %vm125_vm1  ;;  %v2080_v35 = vld [vmem:[%s2229_s1 + $0xe0] sm:$0xff]  ;;  %v2085_v36 = vld [vmem:[%s2229_s1 + $0xd0] sm:$0xff]  ;;  %vm209_vm3 = vcmask 130048   ;;  %vm1401_vm4 = vcmask 523264  }
   0x7   :  { %1767 = vmatprep.subr.bf16.mxu1 %v1766_v6  ;;  %v2027_v9 = vshrl.u32 %v33_v8, 7  ;;  %s1962_s25 = smov 112   ;;  %s1963_s26 = smov 80  }
   0x8   :  { %s1964_s3 = smov 56   ;;  %s1965_s4 = smov 72  }
   0x9   :  { %v35_v10 = vsub.s32 0, %v2027_v9  ;;  %s1966_s5 = smov 64   ;;  %s1967_s6 = smov 104  }
   0xa   :  { %1769 = vmatpush3.bf16.msra.mxu1 %v1766_v6  ;;  %s1968_s7 = smov 32   ;;  %s1969_s8 = smov 48  }
   0xb   :  { %v36_v12 = vrot.slane %v2033_v11, %v35_v10  ;;  %s1970_s9 = smov 40  }
   0xd   :  { %1654 = vmatmul.mubr.msk.f32.vlgmr.msra.gmra.mrb[0].mxu1 %vm37_vm0, %v2023_v7 }
  0xe0   :  { %v1655_v13 = vpop.f32.mrb[0].mxu1 }
  0xe1   :  { %v2036_v14 = vadd.f32 %v1655_v13, %v36_v12  ;;  %v110_v15 = vpop.f32.mrb[1].mxu1 }
  0xe2   :  { %v2038_v16 = vadd.f32 %v110_v15, %v36_v12 }
  0xe4   :  { %319 = vrot.lane.b32.xlu1 %v2038_v16, %s1959_s0  ;;  %1660 = vmatprep.mubr.msk.f32.mxu1 %vm125_vm1, %v2038_v16  ;;  %v2045_v17 = vpack.i.bf16 %v2036_v14, %v2038_v16 }
  0xe6   :  { %1856 = vrot.lane.b32.xlu0 %v2045_v17, %s1960_s23 }
  0xe8   :  { %321 = vrot.lane.b32.xlu1 %v2036_v14, %s1959_s0 }
  0xea   :  { %1861 = vrot.lane.b32.xlu0 %v2045_v17, %s1961_s24 }
  0xec   :  { %689 = vrot.lane.b32.xlu1 %v2038_v16, %s1962_s25 }
  0xee   :  { %1866 = vrot.lane.b32.xlu0 %v2045_v17, %s1963_s26 }
  0xf2   :  { %691 = vrot.lane.b32.xlu0 %v2036_v14, %s1962_s25 }
 0x156   :  { %v320_v28 = vpop.permute.xlu1 %319 }
 0x158   :  { %v1857_v18 = vpop.permute.xlu0 %1856 }
 0x159   :  { %v1859_v19 = vunpack.i.h.bf16 %v1857_v18  ;;  %v1858_v20 = vunpack.i.l.bf16 %v1857_v18 }
 0x15a   :  { %v322_v32 = vpop.permute.xlu1 %321 }
 0x15b   :  { %v1770_v22 = vpack.c.bf16 %v1859_v19, %v1858_v20 }
 0x15c   :  { %v1862_v23 = vpop.permute.xlu0 %1861 }
 0x15d   :  { %v1864_v24 = vunpack.i.h.bf16 %v1862_v23  ;;  %v1863_v25 = vunpack.i.l.bf16 %v1862_v23  ;;  %1772 = vmatprep.subr.msk.bf16.mxu1 %vm2055_vm2, %v1770_v22 }
 0x15e   :  { %1775 = vmatpush3.bf16.xpose.msk.msra.mxu1 %vm2055_vm2, %v1770_v22  ;;  %v690_v33 = vpop.permute.xlu1 %689 }
 0x15f   :  { %v1780_v26 = vpack.c.bf16 %v1864_v24, %v1863_v25 }
 0x160   :  { %v1867_v27 = vpop.permute.xlu0 %1866 }
 0x161   :  { %v1869_v29 = vunpack.i.h.bf16 %v1867_v27  ;;  %v1868_v30 = vunpack.i.l.bf16 %v1867_v27  ;;  %1782 = vmatprep.subr.msk.bf16.mxu1 %vm2055_vm2, %v1780_v26 }
 0x163   :  { %v1790_v31 = vpack.c.bf16 %v1869_v29, %v1868_v30 }
 0x164   :  { %v692_v34 = vpop.permute.xlu0 %691 }
 0x165   :  { %1661 = vmatmul.mubr.msk.f32.vlgmr.msra.gmra.mrb[2].mxu1 %vm125_vm1, %v2036_v14 }
 0x166   :  { %1785 = vmatpush3.bf16.xpose.msk.msra.mxu1 %vm2055_vm2, %v1780_v26  ;;  %1674 = vmatprep.mubr.msk.f32.mxu1 %vm125_vm1, %v320_v28 }
 0x167   :  { %1792 = vmatprep.subr.msk.bf16.mxu1 %vm2055_vm2, %v1790_v31 }
 0x16d   :  { %1675 = vmatmul.mubr.msk.f32.vlgmr.msra.gmra.mrb[4].mxu1 %vm125_vm1, %v322_v32 }
 0x16e   :  { %1795 = vmatpush3.bf16.xpose.msk.msra.mxu1 %vm2055_vm2, %v1790_v31  ;;  %1698 = vmatprep.mubr.msk.f32.mxu1 %vm125_vm1, %v690_v33 }
 0x175   :  { %1699 = vmatmul.mubr.msk.f32.vlgmr.msra.gmra.mrb[6].mxu1 %vm125_vm1, %v692_v34 }
 0x238   :  { %v1662_v37 = vpop.f32.mrb[2].mxu1 }
 0x239   :  { %v206_v38 = vadd.f32 %v1662_v37, %v2080_v35  ;;  %v200_v39 = vpop.f32.mrb[3].mxu1 }
 0x23a   :  { %v201_v40 = vadd.f32 %v200_v39, %v2085_v36 }
 0x23b   :  { %v213_v41 = vsel %vm209_vm3, %v206_v38, -inf }
 0x23c   :  { %214 = vmax.xlane.f32.xlu0 %v213_v41  ;;  %v210_v42 = vsel %vm209_vm3, %v201_v40, -inf }
 0x23d   :  { %211 = vmax.xlane.f32.xlu1 %v210_v42 }
 0x240   :  { %v1676_v43 = vpop.f32.mrb[4].mxu1 }
 0x241   :  { %v407_v44 = vadd.f32 %v1676_v43, %v2080_v35  ;;  %v401_v45 = vpop.f32.mrb[5].mxu1 }
 0x242   :  { %v402_v46 = vadd.f32 %v401_v45, %v2085_v36 }
 0x243   :  { %v413_v47 = vsel %vm209_vm3, %v407_v44, -inf }
 0x244   :  { %414 = vmax.xlane.f32.xlu1 %v413_v47  ;;  %v410_v48 = vsel %vm209_vm3, %v402_v46, -inf }
 0x245   :  { %411 = vmax.xlane.f32.xlu0 %v410_v48 }
 0x248   :  { %v1700_v49 = vpop.f32.mrb[6].mxu1 }
 0x249   :  { %v771_v50 = vpop.f32.mrb[7].mxu1  ;;  %v777_v19 = vadd.f32 %v1700_v49, %v2080_v35 }
 0x24a   :  { %v772_v18 = vadd.f32 %v771_v50, %v2085_v36 }
 0x24b   :  { %v783_v22 = vsel %vm209_vm3, %v777_v19, -inf }
 0x24c   :  { %v780_v20 = vsel %vm209_vm3, %v772_v18, -inf }
 0x2c9   :  { %v215_v51 = vpop.xlane.xlu0 %214 }
 0x2ca   :  { %v217_v52 = vsub.f32 %v206_v38, %v215_v51  ;;  %v212_v53 = vpop.xlane.xlu1 %211 }
 0x2cb   :  { %v216_v54 = vsub.f32 %v201_v40, %v212_v53 }
 0x2cc   :  { %v220_v55 = vmul.f32 1.442695, %v217_v52 }
 0x2cd   :  { %v218_v56 = vmul.f32 1.442695, %v216_v54 }
 0x2ce   :  { %1895 = vpow2.f32 %v220_v55 }
 0x2cf   :  { %1897 = vpow2.f32 %v218_v56 }
 0x2d1   :  { %v415_v57 = vpop.xlane.xlu1 %414 }
 0x2d2   :  { %v417_v58 = vsub.f32 %v407_v44, %v415_v57  ;;  %v412_v59 = vpop.xlane.xlu0 %411 }
 0x2d3   :  { %v416_v60 = vsub.f32 %v402_v46, %v412_v59 }
 0x2d4   :  { %v420_v61 = vmul.f32 1.442695, %v417_v58 }
 0x2d5   :  { %v418_v62 = vmul.f32 1.442695, %v416_v60 }
 0x2d6   :  { %1899 = vpow2.f32 %v420_v61 }
 0x2d7   :  { %1901 = vpow2.f32 %v418_v62 }
 0x2d8   :  { %v1896_v63 = vpop.eup %1895 }
 0x2d9   :  { %v1898_v3 = vpop.eup %1897  ;;  %v225_v6 = vsel %vm209_vm3, %v1896_v63, 0.0 }
 0x2da   :  { %226 = vadd.xlane.f32.xlu1 %v225_v6  ;;  %v222_v8 = vsel %vm209_vm3, %v1898_v3, 0.0 }
 0x2db   :  { %223 = vadd.xlane.f32.xlu0 %v222_v8 }
 0x2e0   :  { %v2097_v10 = vpop.eup %1899 }
 0x2e1   :  { %v1902_v12 = vpop.eup %1901  ;;  %v425_v13 = vsel %vm209_vm3, %v2097_v10, 0.0 }
 0x2e2   :  { %426 = vadd.xlane.f32.xlu1 %v425_v13  ;;  %v422_v15 = vsel %vm209_vm3, %v1902_v12, 0.0 }
 0x2e3   :  { %423 = vadd.xlane.f32.xlu0 %v422_v15 }
 0x2f3   :  { %1876 = vrot.lane.b32.xlu1 %v2045_v17, %s1964_s3 }
 0x2f7   :  { %1881 = vrot.lane.b32.xlu1 %v2045_v17, %s1965_s4 }
 0x2f9   :  { %1871 = vrot.lane.b32.xlu0 %v2045_v17, %s1966_s5 }
 0x2fb   :  { %978 = vrot.lane.b32.xlu1 %v2036_v14, %s1967_s6 }
 0x2fd   :  { %976 = vrot.lane.b32.xlu0 %v2038_v16, %s1967_s6 }
 0x31c   :  { %781 = vmax.xlane.f32.xlu0 %v780_v20 }
 0x31f   :  { %784 = vmax.xlane.f32.xlu1 %v783_v22 }
 0x330   :  { %520 = vrot.lane.b32.xlu1 %v1997_v1, %s1968_s7 }
 0x334   :  { %1886 = vrot.lane.b32.xlu1 %v2045_v17, %s1969_s8 }
 0x367   :  { %v227_v16 = vpop.xlane.xlu1 %226 }
 0x368   :  { %v224_v14 = vpop.xlane.xlu0 %223 }
 0x369   :  { %1903 = vrcp.f32 %v224_v14 }
 0x36a   :  { %1905 = vrcp.f32 %v227_v16 }
 0x36f   :  { %v427_v23 = vpop.xlane.xlu1 %426 }
 0x370   :  { %v424_v24 = vpop.xlane.xlu0 %423 }
 0x371   :  { %1907 = vrcp.f32 %v424_v24 }
 0x372   :  { %1909 = vrcp.f32 %v427_v23 }
 0x373   :  { %v1904_v25 = vpop.eup %1903  ;;  %v1877_v26 = vpop.permute.xlu1 %1876 }
 0x374   :  { %v1872_v27 = vpop.permute.xlu0 %1871  ;;  %v230_v28 = vmul.f32 %v1904_v25, %v1898_v3  ;;  %v1879_v29 = vunpack.i.h.bf16 %v1877_v26  ;;  %v1878_v30 = vunpack.i.l.bf16 %v1877_v26  ;;  %v1906_v34 = vpop.eup %1905 }
 0x375   :  { %v1874_v31 = vunpack.i.h.bf16 %v1872_v27  ;;  %v1873_v32 = vunpack.i.l.bf16 %v1872_v27  ;;  %v231_v43 = vmul.f32 %v1906_v34, %v1896_v63 }
 0x376   :  { %1667 = vmatprep.mubr.msk.f32.mxu0 %vm209_vm3, %v230_v28  ;;  %v1786_v40 = vpack.c.bf16 %v1879_v29, %v1878_v30 }
 0x377   :  { %v1882_v1 = vpop.permute.xlu1 %1881  ;;  %v1776_v33 = vpack.c.bf16 %v1874_v31, %v1873_v32 }
 0x378   :  { %v1884_v37 = vunpack.i.h.bf16 %v1882_v1  ;;  %v1883_v38 = vunpack.i.l.bf16 %v1882_v1  ;;  %v977_v39 = vpop.permute.xlu0 %976 }
 0x379   :  { %1777 = vmatprep.subr.bf16.mxu0 %v1776_v33  ;;  %1717 = vmatprep.mubr.msk.f32.mxu1 %vm125_vm1, %v977_v39 }
 0x37a   :  { %v1800_v41 = vpack.c.bf16 %v1884_v37, %v1883_v38  ;;  %1779 = vmatpush3.bf16.msra.mxu0 %v1776_v33 }
 0x37b   :  { %v1908_v42 = vpop.eup %1907  ;;  %1787 = vmatprep.subr.bf16.mxu0 %v1786_v40  ;;  %v979_v47 = vpop.permute.xlu1 %978 }
 0x37c   :  { %v1910_v44 = vpop.eup %1909  ;;  %1802 = vmatprep.subr.msk.bf16.mxu1 %vm2055_vm2, %v1800_v41  ;;  %v430_v45 = vmul.f32 %v1908_v42, %v1902_v12 }
 0x37d   :  { %1668 = vmatmul.mubr.msk.f32.vlgmr.msra.gmra.mrb[0].mxu0 %vm209_vm3, %v231_v43  ;;  %1805 = vmatpush3.bf16.xpose.msk.msra.mxu1 %vm2055_vm2, %v1800_v41  ;;  %v431_v46 = vmul.f32 %v1910_v44, %v2097_v10 }
 0x37e   :  { %1789 = vmatpush3.bf16.msra.mxu0 %v1786_v40  ;;  %1681 = vmatprep.mubr.msk.f32.mxu0 %vm209_vm3, %v430_v45 }
 0x381   :  { %1682 = vmatmul.mubr.msk.f32.vlgmr.msra.gmra.mrb[2].mxu0 %vm209_vm3, %v431_v46  ;;  %v1265_v46 = vsub.s32 1, %v2027_v9 }
 0x384   :  { %1718 = vmatmul.mubr.msk.f32.vlgmr.msra.gmra.mrb[8].mxu1 %vm125_vm1, %v979_v47  ;;  %v1266_v47 = vrot.slane %v2033_v11, %v1265_v46 }
 0x3a9   :  { %v782_v48 = vpop.xlane.xlu0 %781 }
 0x3aa   :  { %v786_v49 = vsub.f32 %v772_v18, %v782_v48 }
 0x3ac   :  { %v785_v50 = vpop.xlane.xlu1 %784  ;;  %v788_v52 = vmul.f32 1.442695, %v786_v49 }
 0x3ad   :  { %v787_v51 = vsub.f32 %v777_v19, %v785_v50 }
 0x3af   :  { %v790_v53 = vmul.f32 1.442695, %v787_v51 }
 0x3b0   :  { %v521_v54 = vpop.permute.xlu1 %520 }
 0x3b1   :  { %1911 = vpow2.f32 %v790_v53  ;;  %1684 = vmatprep.subr.mxu0 %v521_v54 }
 0x3b2   :  { %1685 = vmatpush3.msra.mxu0 %v521_v54  ;;  %1913 = vpow2.f32 %v788_v52 }
 0x3b4   :  { %v1887_v60 = vpop.permute.xlu1 %1886 }
 0x3b5   :  { %v1889_v3 = vunpack.i.h.bf16 %v1887_v60  ;;  %v1888_v6 = vunpack.i.l.bf16 %v1887_v60 }
 0x3b7   :  { %v1796_v12 = vpack.c.bf16 %v1889_v3, %v1888_v6  ;;  %v17_v3 = vld [vmem:[%s2229_s1 + $0x18] sm:$0xff] }
 0x3bb   :  { %v1912_v21 = vpop.eup %1911 }
 0x3bc   :  { %v795_v55 = vsel %vm209_vm3, %v1912_v21, 0.0  ;;  %v1914_v56 = vpop.eup %1913 }
 0x3bd   :  { %796 = vadd.xlane.f32.xlu0 %v795_v55  ;;  %v792_v57 = vsel %vm209_vm3, %v1914_v56, 0.0 }
 0x3c1   :  { %793 = vadd.xlane.f32.xlu0 %v792_v57 }
 0x3d7   :  { %605 = vrot.lane.b32.xlu0 %v1992_v0, %s1968_s7 }
 0x44a   :  { %v797_v58 = vpop.xlane.xlu0 %796 }
 0x44e   :  { %v794_v59 = vpop.xlane.xlu0 %793 }
 0x44f   :  { %1915 = vrcp.f32 %v794_v59 }
 0x450   :  { %v1669_v61 = vpop.f32.mrb[0].mxu0  ;;  %1917 = vrcp.f32 %v797_v58 }
 0x451   :  { %v310_v62 = vpop.f32.mrb[1].mxu0 }
 0x452   :  { %v606_v63 = vpop.permute.xlu0 %605 }
 0x453   :  { %1689 = vmatprep.subr.mxu0 %v606_v63 }
 0x454   :  { %v1683_v8 = vpop.f32.mrb[2].mxu0 }
 0x455   :  { %v510_v10 = vpop.f32.mrb[3].mxu0 }
 0x456   :  { %1686 = vmatprep.mubr.msk.f32.mxu0 %vm125_vm1, %v510_v10  ;;  %v21_v10 = vld [vmem:[%s2229_s1 + $0x38] sm:$0xff] }
 0x457   :  { %1687 = vmatmul.mubr.msk.f32.vlgmr.msra.gmra.mrb[4].mxu0 %vm125_vm1, %v1683_v8  ;;  %v1719_v13 = vpop.f32.mrb[8].mxu1  ;;  %v19_v8 = vld [vmem:[%s2229_s1 + $0x28] sm:$0xff] }
 0x458   :  { %1690 = vmatpush3.msra.mxu0 %v606_v63  ;;  %v1064_v0 = vadd.f32 %v1719_v13, %v2080_v35  ;;  %1691 = vmatprep.mubr.msk.f32.mxu0 %vm125_vm1, %v310_v62  ;;  %v1058_v15 = vpop.f32.mrb[9].mxu1  ;;  %v22_v13 = vld [vmem:[%s2229_s1 + $0x40] sm:$0xff] }
 0x459   :  { %1797 = vmatprep.subr.bf16.mxu0 %v1796_v12  ;;  %v1059_v18 = vadd.f32 %v1058_v15, %v2085_v36  ;;  %v1916_v20 = vpop.eup %1915  ;;  %v24_v15 = vld [vmem:[%s2229_s1 + $0x60] sm:$0xff] }
 0x45a   :  { %v1070_v19 = vsel %vm209_vm3, %v1064_v0, -inf  ;;  %v1918_v14 = vpop.eup %1917  ;;  %v800_v16 = vmul.f32 %v1916_v20, %v1914_v56 }
 0x45b   :  { %1071 = vmax.xlane.f32.xlu0 %v1070_v19  ;;  %v1067_v22 = vsel %vm209_vm3, %v1059_v18, -inf  ;;  %v801_v35 = vmul.f32 %v1918_v14, %v1912_v21  ;;  %v25_v19 = vld [vmem:[%s2229_s1 + $0x70] sm:$0xff] }
 0x45c   :  { %1068 = vmax.xlane.f32.xlu1 %v1067_v22  ;;  %v1822_v20 = vpack.c.bf16 %v25_v19, %v24_v15  ;;  %v26_v22 = vld [vmem:[%s2229_s1 + $0x80] sm:$0xff]  ;;  %v27_v14 = vld [vmem:[%s2229_s1 + $0x90] sm:$0xff]  ;;  %v1513_v15 = vsub.s32 6, %v2027_v9 }
 0x45e   :  { %v1514_v19 = vrot.slane %v2033_v11, %v1513_v15 }
 0x45f   :  { %1692 = vmatmul.mubr.msk.f32.vlgmr.msra.gmra.mrb[4].mxu0 %vm125_vm1, %v1669_v61 }
 0x460   :  { %1799 = vmatpush3.bf16.msra.mxu0 %v1796_v12  ;;  %1705 = vmatprep.mubr.msk.f32.mxu0 %vm209_vm3, %v800_v16  ;;  %v1814_v12 = vpack.c.bf16 %v21_v10, %v19_v8  ;;  %v1826_v16 = vpack.c.bf16 %v27_v14, %v26_v22 }
 0x463   :  { %1706 = vmatmul.mubr.msk.f32.vlgmr.msra.gmra.mrb[6].mxu0 %vm209_vm3, %v801_v35 }
 0x4e8   :  { %v1072_v23 = vpop.xlane.xlu0 %1071 }
 0x4e9   :  { %v1074_v24 = vsub.f32 %v1064_v0, %v1072_v23  ;;  %v1069_v36 = vpop.xlane.xlu1 %1068  ;;  %v23_v0 = vld [vmem:[%s2229_s1 + $0x50] sm:$0xff] }
 0x4ea   :  { %v1073_v25 = vsub.f32 %v1059_v18, %v1069_v36  ;;  %v1818_v18 = vpack.c.bf16 %v23_v0, %v22_v13 }
 0x4eb   :  { %v1077_v26 = vmul.f32 1.442695, %v1074_v24 }
 0x4ec   :  { %v1075_v27 = vmul.f32 1.442695, %v1073_v25 }
 0x4ed   :  { %1919 = vpow2.f32 %v1077_v26 }
 0x4ee   :  { %1921 = vpow2.f32 %v1075_v27  ;;  %v1300_v27 = vsub.s32 2, %v2027_v9 }
 0x4f7   :  { %v1920_v28 = vpop.eup %1919 }
 0x4f8   :  { %v1922_v29 = vpop.eup %1921  ;;  %v1082_v30 = vsel %vm209_vm3, %v1920_v28, 0.0 }
 0x4f9   :  { %1083 = vadd.xlane.f32.xlu1 %v1082_v30  ;;  %v1079_v31 = vsel %vm209_vm3, %v1922_v29, 0.0 }
 0x4fa   :  { %1080 = vadd.xlane.f32.xlu0 %v1079_v31 }
 0x50a   :  { %1891 = vrot.lane.b32.xlu1 %v2045_v17, %s1970_s9 }
 0x50e   :  { %1177 = vrot.lane.b32.xlu1 %v2009_v4, %s1968_s7 }
 0x510   :  { %890 = vrot.lane.b32.xlu0 %v2002_v2, %s1968_s7 }
 0x536   :  { %v1707_v32 = vpop.f32.mrb[6].mxu0 }
 0x537   :  { %v880_v1 = vpop.f32.mrb[7].mxu0 }
 0x538   :  { %1710 = vmatprep.mubr.msk.f32.mxu0 %vm125_vm1, %v880_v1 }
 0x586   :  { %v1084_v33 = vpop.xlane.xlu1 %1083 }
 0x587   :  { %1923 = vrcp.f32 %v1084_v33  ;;  %v1081_v34 = vpop.xlane.xlu0 %1080 }
 0x588   :  { %1925 = vrcp.f32 %v1081_v34 }
 0x58a   :  { %v1892_v37 = vpop.permute.xlu1 %1891 }
 0x58b   :  { %v1894_v38 = vunpack.i.h.bf16 %v1892_v37  ;;  %v1893_v39 = vunpack.i.l.bf16 %v1892_v37  ;;  %v891_v40 = vpop.permute.xlu0 %890 }
 0x58c   :  { %1708 = vmatprep.subr.mxu0 %v891_v40 }
 0x58d   :  { %v1806_v17 = vpack.c.bf16 %v1894_v38, %v1893_v39  ;;  %1709 = vmatpush3.msra.mxu0 %v891_v40  ;;  %v28_v40 = vld [vmem:[%s2229_s1 + $0xa0] sm:$0xff] }
 0x58e   :  { %1711 = vmatmul.mubr.msk.f32.vlgmr.msra.gmra.mrb[4].mxu0 %vm125_vm1, %v1707_v32  ;;  %v1178_v4 = vpop.permute.xlu1 %1177 }
 0x58f   :  { %1807 = vmatprep.subr.bf16.mxu0 %v1806_v17 }
 0x590   :  { %1809 = vmatpush3.bf16.msra.mxu0 %v1806_v17  ;;  %v29_v17 = vld [vmem:[%s2229_s1 + $0xb0] sm:$0xff] }
 0x591   :  { %v1924_v2 = vpop.eup %1923  ;;  %1727 = vmatprep.subr.mxu0 %v1178_v4 }
 0x592   :  { %v1926_v41 = vpop.eup %1925  ;;  %v1088_v43 = vmul.f32 %v1924_v2, %v1920_v28  ;;  %v1306_v28 = vsub.s32 3, %v2027_v9  ;;  %v1312_v2 = vsub.s32 4, %v2027_v9 }
 0x593   :  { %v1087_v42 = vmul.f32 %v1926_v41, %v1922_v29  ;;  %v1301_v29 = vrot.slane %v2033_v11, %v1300_v27 }
 0x594   :  { %v1307_v32 = vrot.slane %v2033_v11, %v1306_v28  ;;  %v1313_v41 = vrot.slane %v2033_v11, %v1312_v2 }
 0x595   :  { %1724 = vmatprep.mubr.msk.f32.mxu0 %vm209_vm3, %v1087_v42 }
 0x596   :  { %1725 = vmatmul.mubr.msk.f32.vlgmr.msra.gmra.mrb[8].mxu0 %vm209_vm3, %v1088_v43 }
 0x597   :  { %1728 = vmatpush3.msra.mxu0 %v1178_v4  ;;  %v1830_v4 = vpack.c.bf16 %v29_v17, %v28_v40 }
 0x598   :  { %1819 = vmatprep.subr.bf16.mxu0 %v1818_v18 }
 0x669   :  { %v1726_v44 = vpop.f32.mrb[8].mxu0 }
 0x66a   :  { %v1167_v45 = vpop.f32.mrb[9].mxu0 }
 0x66b   :  { %1729 = vmatprep.mubr.msk.f32.mxu0 %vm125_vm1, %v1167_v45 }
 0x66c   :  { %1730 = vmatmul.mubr.msk.f32.vlgmr.msra.gmra.mrb[4].mxu0 %vm125_vm1, %v1726_v44 }
 0x66d   :  { %1821 = vmatpush3.bf16.msra.mxu0 %v1818_v18  ;;  %v1519_v18 = vsub.s32 7, %v2027_v9 }
 0x66e   :  { %1823 = vmatprep.subr.bf16.mxu0 %v1822_v20 }
 0x671   :  { %1825 = vmatpush3.bf16.msra.mxu0 %v1822_v20 }
 0x672   :  { %1827 = vmatprep.subr.bf16.mxu0 %v1826_v16 }
 0x675   :  { %1829 = vmatpush3.bf16.msra.mxu0 %v1826_v16  ;;  %v1520_v16 = vrot.slane %v2033_v11, %v1519_v18 }
 0x676   :  { %1831 = vmatprep.subr.bf16.mxu0 %v1830_v4 }
 0x679   :  { %1833 = vmatpush3.bf16.msra.mxu0 %v1830_v4 }
 0x73f   :  { %v1731_v48 = vpop.f32.mrb[4].mxu0 }
 0x740   :  { %v1268_v49 = vadd.f32 %v1731_v48, %v1266_v47  ;;  %v1252_v50 = vpop.f32.mrb[5].mxu0  ;;  %v1399_v48 = vsub.s32 5, %v2027_v9 }
 0x741   :  { %v1267_v51 = vadd.f32 %v1266_v47, %v1252_v50 }
 0x742   :  { %v1270_v52 = vadd.f32 %v1268_v49, %v2023_v7  ;;  %v1400_v49 = vrot.slane %v2033_v11, %v1399_v48 }
 0x743   :  { %v1269_v53 = vadd.f32 %v1267_v51, %v2014_v5  ;;  %v15_v5 = vld [vmem:[%s2229_s1 + $0x8] sm:$0xff]  ;;  %s1971_s1 = smov [#allocation2]  }
 0x744   :  { %v1274_v54 = vsel %vm37_vm0, %v1270_v52, 0.0  ;;  %v1810_v6 = vpack.c.bf16 %v17_v3, %v15_v5  ;;  %s1530_s5 = sshll.u32 %s1971_s1, 4  ;;  %s1531_s5 = int_to_ptr.vmem [resolvable:$true] %s1530_s5 }
 0x745   :  { %1275 = vadd.xlane.f32.xlu1 %v1274_v54  ;;  %v1271_v21 = vsel %vm37_vm0, %v1269_v53, 0.0  ;;  %s1935_s6 = scalar_lea.vmem %s1531_s5, 256  ;;  %p1940_p1 = scmp.lt.s32.totalorder %s1531_s5, %s1531_s5 }
 0x746   :  { %1272 = vadd.xlane.f32.xlu0 %v1271_v21  ;;  %1811 = vmatprep.subr.bf16.mxu1 %v1810_v6  ;;  %p1936_p0 = scmp.ne.s32.totalorder %s1531_s5, %s1935_s6  ;;  %p1941_p2 = scmp.lt.s32.totalorder %s1935_s6, %s1935_s6 }
 0x747   :  { %1813 = vmatpush3.bf16.msra.mxu1 %v1810_v6 }
 0x748   :  { %1815 = vmatprep.subr.bf16.mxu1 %v1814_v12  ;;  %p1942_p3 = por %p1941_p2, %p1940_p1 }
 0x74a   :  { %p1943_p4 = pnand %p1942_p3, %p1936_p0 }
 0x74b   :  { %1817 = vmatpush3.bf16.msra.mxu1 %v1814_v12 }
 0x7d2   :  { %v1276_v55 = vpop.xlane.xlu1 %1275 }
 0x7d3   :  { %v1279_v56 = vmul.f32 0.03125, %v1276_v55  ;;  %v1273_v57 = vpop.xlane.xlu0 %1272 }
 0x7d4   :  { %v1278_v58 = vmul.f32 0.03125, %v1273_v57 }
 0x7d5   :  { %v1281_v59 = vsub.f32 %v1270_v52, %v1279_v56 }
 0x7d6   :  { %v1280_v60 = vsub.f32 %v1269_v53, %v1278_v58 }
 0x7d7   :  { %v1283_v63 = vmul.f32 %v1281_v59, %v1281_v59 }
 0x7d8   :  { %v1282_v61 = vmul.f32 %v1280_v60, %v1280_v60 }
 0x7d9   :  { %v1287_v7 = vsel %vm37_vm0, %v1283_v63, 0.0 }
 0x7da   :  { %v1284_v62 = vsel %vm37_vm0, %v1282_v61, 0.0 }
 0x7db   :  { %1285 = vadd.xlane.f32.xlu0 %v1284_v62 }
 0x7df   :  { %1288 = vadd.xlane.f32.xlu0 %v1287_v7 }
 0x868   :  { %v1286_v35 = vpop.xlane.xlu0 %1285 }
 0x869   :  { %v1290_v23 = vmul.f32 0.03125, %v1286_v35 }
 0x86b   :  { %v1292_v24 = vadd.f32 1e-05, %v1290_v23 }
 0x86c   :  { %v1289_v36 = vpop.xlane.xlu0 %1288 }
 0x86d   :  { %1927 = vrsqrt.f32 %v1292_v24  ;;  %v1291_v25 = vmul.f32 0.03125, %v1289_v36 }
 0x86f   :  { %v1293_v26 = vadd.f32 1e-05, %v1291_v25 }
 0x871   :  { %1929 = vrsqrt.f32 %v1293_v26 }
 0x877   :  { %v1928_v30 = vpop.eup %1927 }
 0x878   :  { %v1296_v31 = vmul.f32 %v1928_v30, %v1280_v60 }
 0x87a   :  { %v1302_v1 = vmul.f32 %v1301_v29, %v1296_v31 }
 0x87b   :  { %v1930_v33 = vpop.eup %1929 }
 0x87c   :  { %v1297_v34 = vmul.f32 %v1930_v33, %v1281_v59  ;;  %v1308_v37 = vadd.f32 %v1307_v32, %v1302_v1 }
 0x87e   :  { %v1303_v38 = vmul.f32 %v1301_v29, %v1297_v34  ;;  %1740 = vmatprep.mubr.msk.f32.mxu1 %vm37_vm0, %v1308_v37 }
 0x880   :  { %v1309_v39 = vadd.f32 %v1307_v32, %v1303_v38 }
 0x882   :  { %1741 = vmatmul.mubr.msk.f32.vlgmr.msra.gmra.mrb[10].mxu1 %vm37_vm0, %v1309_v39 }
 0x955   :  { %v1742_v42 = vpop.f32.mrb[10].mxu1 }
 0x956   :  { %v1392_v43 = vadd.f32 %v1742_v42, %v1313_v41  ;;  %v1386_v44 = vpop.f32.mrb[11].mxu1 }
 0x957   :  { %v1387_v45 = vadd.f32 %v1386_v44, %v1313_v41 }
 0x958   :  { %v1396_v47 = vmax.f32 %v1392_v43, 0.0 }
 0x959   :  { %v1395_v46 = vmax.f32 %v1387_v45, 0.0 }
 0x95b   :  { %1759 = vmatprep.mubr.msk.f32.mxu0 %vm1401_vm4, %v1395_v46 }
 0x95c   :  { %1760 = vmatmul.mubr.msk.f32.vlgmr.msra.gmra.mrb[10].mxu0 %vm1401_vm4, %v1396_v47 }
 0xa2f   :  { %v1761_v50 = vpop.f32.mrb[10].mxu0 }
 0xa30   :  { %v1480_v51 = vadd.f32 %v1761_v50, %v1400_v49  ;;  %v1474_v52 = vpop.f32.mrb[11].mxu0 }
 0xa31   :  { %v1475_v53 = vadd.f32 %v1474_v52, %v1400_v49 }
 0xa32   :  { %v1484_v54 = vadd.f32 %v1480_v51, %v1309_v39 }
 0xa33   :  { %v1483_v21 = vadd.f32 %v1475_v53, %v1308_v37 }
 0xa34   :  { %v1488_v55 = vsel %vm37_vm0, %v1484_v54, 0.0 }
 0xa35   :  { %1489 = vadd.xlane.f32.xlu0 %v1488_v55  ;;  %v1485_v56 = vsel %vm37_vm0, %v1483_v21, 0.0 }
 0xa36   :  { %1486 = vadd.xlane.f32.xlu1 %v1485_v56 }
 0xac2   :  { %v1490_v57 = vpop.xlane.xlu0 %1489 }
 0xac3   :  { %v1492_v58 = vmul.f32 0.03125, %v1490_v57  ;;  %v1487_v59 = vpop.xlane.xlu1 %1486 }
 0xac4   :  { %v1491_v60 = vmul.f32 0.03125, %v1487_v59 }
 0xac5   :  { %v1494_v61 = vsub.f32 %v1484_v54, %v1492_v58 }
 0xac6   :  { %v1493_v62 = vsub.f32 %v1483_v21, %v1491_v60 }
 0xac7   :  { %v1496_v63 = vmul.f32 %v1494_v61, %v1494_v61 }
 0xac8   :  { %v1495_v7 = vmul.f32 %v1493_v62, %v1493_v62 }
 0xac9   :  { %v1500_v5 = vsel %vm37_vm0, %v1496_v63, 0.0 }
 0xaca   :  { %1501 = vadd.xlane.f32.xlu0 %v1500_v5  ;;  %v1497_v3 = vsel %vm37_vm0, %v1495_v7, 0.0 }
 0xacb   :  { %1498 = vadd.xlane.f32.xlu1 %v1497_v3 }
 0xb57   :  { %v1502_v6 = vpop.xlane.xlu0 %1501 }
 0xb58   :  { %v1504_v8 = vmul.f32 0.03125, %v1502_v6  ;;  %v1499_v10 = vpop.xlane.xlu1 %1498 }
 0xb59   :  { %v1503_v12 = vmul.f32 0.03125, %v1499_v10 }
 0xb5a   :  { %v1506_v13 = vadd.f32 1e-05, %v1504_v8 }
 0xb5b   :  { %v1505_v0 = vadd.f32 1e-05, %v1503_v12 }
 0xb5c   :  { %1931 = vrsqrt.f32 %v1506_v13 }
 0xb5d   :  { %1933 = vrsqrt.f32 %v1505_v0 }
 0xb66   :  { %v1932_v20 = vpop.eup %1931 }
 0xb67   :  { %v1934_v22 = vpop.eup %1933  ;;  %v1510_v14 = vmul.f32 %v1932_v20, %v1494_v61 }
 0xb68   :  { %v1509_v35 = vmul.f32 %v1934_v22, %v1493_v62 }
 0xb69   :  { %v1516_v23 = vmul.f32 %v1514_v19, %v1510_v14 }
 0xb6a   :  { %v1515_v24 = vmul.f32 %v1514_v19, %v1509_v35 }
 0xb6b   :  { %v1522_v36 = vadd.f32 %v1520_v16, %v1516_v23 }
 0xb6c   :  { %v1521_v25 = vadd.f32 %v1520_v16, %v1515_v24 }
 0xb6d   :  { %1524 = vst.msk [vmem:[#allocation2 + $0x8] sm:$0xff] %vm37_vm0, %v1522_v36 }
 0xb6e   :  { %1523 = vst.msk [vmem:[#allocation2] sm:$0xff] %vm37_vm0, %v1521_v25 }
 0xb6f   :  { %1946 = shalt.err (!%p1943_p4)
}
 0xb70   :  { %s1947_s9 = scalar_lea.hbm %s2230_s2, 256 }
 0xb71   :  { %p1948_p5 = scmp.ne.s32.totalorder %s2230_s2, %s1947_s9  ;;  %p1951_p6 = scmp.lt.u32.totalorder %s1947_s9, %s2230_s2 }
 0xb73   :  { %p1953_p7 = pnand %p1951_p6, %p1948_p5 }
 0xb75   :  { %1956 = shalt.err (!%p1953_p7)
}
 0xb76   :  { %s1972_s14 = smov 128   ;;  %s1973_s15 = smov 8  }
 0xb77   :  { %1536 = dma.vmem_to_hbm [thread:$0]  %s1531_s5, 256, %s2230_s2, [#allocation3], %s1972_s14, %s1972_s14, %s1973_s15  }
 0xb78   :  { %1957 = dma.done.wait [#allocation3], 256  }
 0xb79   :  { %1958 = vsyncadd [#allocation3], 4294967040 }
 0xb7a   :  { %1540 = vsyncpa [#allocation3], 1 }

</bundles_post_ra>
